<compile_context>
chip_gen: v6e
topology: v6e:2x2x1
jax: 0.10.0
libtpu: 0.0.40
codegen_flags: <defaults>
</compile_context>

<pallas_src>
import jax
import jax.numpy as jnp
from jax.experimental import pallas as pl
from jax.experimental.pallas import tpu as pltpu


def _round_up(n: int, m: int) -> int:
    return ((n + m - 1) // m) * m


def _vmem_capacity_bytes() -> int:
    try:
        return int(pltpu.get_tpu_info().vmem_capacity_bytes)
    except Exception:
        return 64 << 20  # conservative (v7x-sized) default


# ---------------------------------------------------------------------------
# Kernels
# ---------------------------------------------------------------------------
def _slab_gather_kernel(fs_ref, x_ref, o_ref):
    """Vectorized VMEM gather: out[f, :] = x[idx[f], :].

    fs_ref: (1, TF, 1) int32   face -> vertex index for this face tile
    x_ref : (1, V, D)          whole per-batch vertex slab (VMEM-resident)
    o_ref : (1, TF, D)
    """
    idx = fs_ref[0]                               # (TF, 1)
    xv = x_ref[0]                                 # (V, D)
    tf, d = idx.shape[0], xv.shape[-1]
    idx2 = jnp.broadcast_to(idx, (tf, d))         # row index per output lane
    # mode="clip": out-of-range indices clamp (torch.gather would raise).
    o_ref[0] = jnp.take_along_axis(xv, idx2, axis=0, mode="clip")


def _onehot_matmul(idx, xv):
    """Exact gather expressed as onehot @ x (MXU path).

    idx: (TF, 1) int32 (already shifted into this vertex tile's local range)
    xv : (TV, D)
    Each output row receives exactly one non-zero product (1.0 * x[v, :]) so
    the result is exact.  Note: non-finite x values elsewhere in the tile can
    poison rows via 0*inf / 0*nan (documented divergence from a true gather).
    """
    tf, tv = idx.shape[0], xv.shape[0]
    vids = jax.lax.broadcasted_iota(jnp.int32, (tf, tv), 1)
    if xv.dtype == jnp.float32:
        # HIGHEST multi-pass keeps the f32 gather bit-exact.
        onehot = (vids == idx).astype(jnp.float32)
        return jnp.dot(onehot, xv, preferred_element_type=jnp.float32,
                       precision=jax.lax.Precision.HIGHEST)
    # 0/1 are exact in bf16/f16: one DEFAULT-precision pass + f32 accumulate
    # reproduces the gather exactly and avoids multi-pass MXU pushes.
    onehot = (vids == idx).astype(xv.dtype)
    return jnp.dot(onehot, xv, preferred_element_type=jnp.float32)


def _tiled_onehot_kernel(fs_ref, x_ref, o_ref):
    """Fallback when the vertex slab is too big for VMEM (or gather doesn't
    lower): one-hot MXU gather, vertex axis innermost ("arbitrary").

    fs_ref: (1, TF, 1) int32, x_ref: (1, TV, D), o_ref: (1, TF, D)
    Output block is resident across the vertex axis; accumulate directly into
    it (no f32 scratch) — each row gets exactly one non-zero term, so
    accumulating in the output dtype is exact.
    """
    v_step = pl.program_id(2)

    @pl.when(v_step == 0)
    def _():
        o_ref[...] = jnp.zeros_like(o_ref)

    xv = x_ref[0]                                 # (TV, D)
    tv = xv.shape[0]
    # Shift the (TF,1) indices instead of adding v_step*TV to the (TF,TV)
    # iota: keeps the iota loop-invariant and saves a full-tile VALU op.
    local_idx = fs_ref[0] - v_step * tv
    o_ref[0] += _onehot_matmul(local_idx, xv).astype(o_ref.dtype)


# ---------------------------------------------------------------------------
# Wrapper
# ---------------------------------------------------------------------------
_SLAB_GATHER_OK: dict = {}   # config -> whether jnp.take_along_axis lowers


def face_fetch_vertex(fs, x, *, face_tile=None, vertex_tile=None):
    """Pallas equivalent of FaceFetchVertex.forward(fs, x)."""
    B, F = fs.shape
    Bx, V, D = x.shape
    assert B == Bx, "batch mismatch between fs and x"
    esize = jnp.dtype(x.dtype).itemsize

    # TODO(synk): torch casts indices to int64; TPU-native index math is
    # 32-bit, so indices are cast to int32 (valid for V < 2**31).
    fs_i = fs.astype(jnp.int32)

    # Per-generation VMEM sizing (v7x: 64 MiB physical vs 128 MiB v5e/v6e).
    vmem_cap = _vmem_capacity_bytes()
    vmem_limit = min(int(0.75 * vmem_cap), 100 << 20)
    vmem_budget = int(0.40 * vmem_cap)   # headroom for double buffers / out

    # ---- face tile (output rows per grid step) ----------------------------
    if face_tile is None:
        tf = min(512, _round_up(F, 8))
        F_pad = _round_up(F, tf)
        # v7x shards "parallel" axes across 2 TensorCores: expose >= 2 tiles.
        while B * (F_pad // tf) < 2 and tf > 8:
            tf = max(8, tf // 2)
            F_pad = _round_up(F, tf)
    else:
        assert face_tile % 8 == 0, "face_tile must be a multiple of 8"
        tf = face_tile
        F_pad = _round_up(F, tf)

    if F_pad != F:
        # Pad with index 0 (valid); padded rows are sliced off at the end.
        fs_i = jnp.pad(fs_i, ((0, 0), (0, F_pad - F)))
    fs_i = fs_i.reshape(B, F_pad, 1)

    # ---- slab path: whole per-batch vertex slab resident in VMEM ----------
    def run_slab():
        return pl.pallas_call(
            _slab_gather_kernel,
            out_shape=jax.ShapeDtypeStruct((B, F_pad, D), x.dtype),
            grid=(B, F_pad // tf),
            in_specs=[
                pl.BlockSpec((1, tf, 1), lambda b, t: (b, t, 0)),
                # Constant block index across face tiles -> x[b] is DMA'd
                # from HBM exactly once per batch.
                pl.BlockSpec((1, V, D), lambda b, t: (b, 0, 0)),
            ],
            out_specs=pl.BlockSpec((1, tf, D), lambda b, t: (b, t, 0)),
            compiler_params=pltpu.CompilerParams(
                dimension_semantics=("parallel", "parallel"),
                vmem_limit_bytes=vmem_limit),
        )(fs_i, x)

    # ---- tiled path: one-hot MXU gather with a vertex reduction -----------
    # TODO(synk): for huge V a DMA-gather (fs via PrefetchScalarGridSpec, x in
    # pl.ANY, make_async_copy of only the needed rows) would cut x HBM traffic
    # to the F*D bytes actually gathered; not implemented here.
    def run_tiled():
        if vertex_tile is None:
            tv = min(2048, _round_up(V, 8))
        else:
            assert vertex_tile % 8 == 0, "vertex_tile must be a multiple of 8"
            tv = vertex_tile
        # Keep the double-buffered x / out tiles inside the VMEM budget.
        while tv > 8 and 2 * (tv + tf) * D * esize > vmem_budget:
            tv = max(8, tv // 2)
        V_pad = _round_up(V, tv)
        x_p = jnp.pad(x, ((0, 0), (0, V_pad - V), (0, 0))) if V_pad != V else x
        return pl.pallas_call(
            _tiled_onehot_kernel,
            out_shape=jax.ShapeDtypeStruct((B, F_pad, D), x.dtype),
            grid=(B, F_pad // tf, V_pad // tv),
            in_specs=[
                pl.BlockSpec((1, tf, 1), lambda b, t, v: (b, t, 0)),
                pl.BlockSpec((1, tv, D), lambda b, t, v: (b, v, 0)),
            ],
            out_specs=pl.BlockSpec((1, tf, D), lambda b, t, v: (b, t, 0)),
            compiler_params=pltpu.CompilerParams(
                dimension_semantics=("parallel", "parallel", "arbitrary"),
                vmem_limit_bytes=vmem_limit),
        )(fs_i, x_p)

    slab_bytes = 2 * V * D * esize + 2 * tf * D * esize + 2 * tf * 4
    use_slab = (vertex_tile is None) and (slab_bytes <= vmem_budget)

    out = None
    if use_slab:
        key = (V, D, str(jnp.dtype(x.dtype)), tf)
        ok = _SLAB_GATHER_OK.get(key)
        if ok is None:
            # Probe once whether the vectorized VMEM gather lowers on this
            # Mosaic toolchain; otherwise fall back to the one-hot MXU path.
            try:
                out = jax.block_until_ready(run_slab())
                _SLAB_GATHER_OK[key] = True
            except Exception:
                _SLAB_GATHER_OK[key] = False
        elif ok:
            out = run_slab()
    if out is None:
        out = run_tiled()

    return out[:, :F, :] if F_pad != F else out


if __name__ == "__main__":
    # Small shapes consistent with the module: 2 meshes, 16 vertices,
    # 12 face-vertex slots (4 triangles), 32-dim vertex features.
    B, V, F, D = 2, 16, 12, 32

    key = jax.random.PRNGKey(0)
    k_x, k_f = jax.random.split(key)
    x = jax.random.normal(k_x, (B, V, D), dtype=jnp.float32)
    fs = jax.random.randint(k_f, (B, F), 0, V, dtype=jnp.int32)

    # Reference: torch.gather(x, dim=1, index=fs[..., None].repeat(1, 1, D))
    ref = jnp.take_along_axis(
        x, jnp.broadcast_to(fs[:, :, None], (B, F, D)), axis=1)

    # Default (slab) path.
    out = jax.block_until_ready(face_fetch_vertex(fs, x))
    assert out.shape == (B, F, D) and out.dtype == x.dtype
    assert bool(jnp.array_equal(out, ref)), "slab path != gather reference"

    # Also exercise the tiled (vertex-reduction) fallback path.
    out_tiled = jax.block_until_ready(
        face_fetch_vertex(fs, x, face_tile=8, vertex_tile=8))
    assert bool(jnp.array_equal(out_tiled, ref)), "tiled path != gather reference"

    print("KERNEL_OK")
</pallas_src>

<mosaic_0001>
module attributes {stable_mosaic.version = 11 : i64} {
  func.func @_tiled_onehot_kernel(%arg0: i32, %arg1: i32, %arg2: i32, %arg3: memref<1x16x1xi32, #tpu.memory_space<vmem>>, %arg4: memref<1x16x32xf32, #tpu.memory_space<vmem>>, %arg5: memref<1x16x32xf32, #tpu.memory_space<vmem>>) attributes {dimension_semantics = [#tpu.dimension_semantics<parallel>, #tpu.dimension_semantics<parallel>, #tpu.dimension_semantics<arbitrary>], iteration_bounds = array<i64: 2, 1, 1>, scalar_prefetch = 0 : i64, scratch_operands = 0 : i64, tpu.core_type = #tpu.core_type<tc>, window_params = [{transform_indices = @transform_0, window_bounds = array<i64: 1, 16, 1>}, {transform_indices = @transform_1, window_bounds = array<i64: 1, 16, 32>}, {transform_indices = @transform_2, window_bounds = array<i64: 1, 16, 32>}]} {
    %c0_i32 = arith.constant 0 : i32
    %0 = arith.cmpi eq, %arg2, %c0_i32 : i32
    %1 = arith.extui %0 : i1 to i32
    %c0_i32_0 = arith.constant 0 : i32
    %2 = arith.cmpi ne, %1, %c0_i32_0 : i32
    scf.if %2 {
      %cst_12 = arith.constant 0.000000e+00 : f32
      %22 = vector.broadcast %cst_12 : f32 to vector<1x16x32xf32>
      %c0_13 = arith.constant 0 : index
      %c0_14 = arith.constant 0 : index
      %c0_15 = arith.constant 0 : index
      %23 = vector.load %arg5[%c0_13, %c0_14, %c0_15] : memref<1x16x32xf32, #tpu.memory_space<vmem>>, vector<1x16x32xf32>
      tpu.vector_store %arg5[%c0_13, %c0_14, %c0_15], %22 {strides = array<i32>} : memref<1x16x32xf32, #tpu.memory_space<vmem>>, vector<1x16x32xf32>,
    } else {
    }
    %c0 = arith.constant 0 : index
    %c0_1 = arith.constant 0 : index
    %c0_2 = arith.constant 0 : index
    %3 = vector.load %arg4[%c0, %c0_1, %c0_2] : memref<1x16x32xf32, #tpu.memory_space<vmem>>, vector<1x16x32xf32>
    %4 = vector.shape_cast %3 : vector<1x16x32xf32> to vector<16x32xf32>
    %c0_3 = arith.constant 0 : index
    %c0_4 = arith.constant 0 : index
    %c0_5 = arith.constant 0 : index
    %5 = vector.load %arg3[%c0_3, %c0_4, %c0_5] : memref<1x16x1xi32, #tpu.memory_space<vmem>>, vector<1x16x1xi32>
    %6 = vector.shape_cast %5 : vector<1x16x1xi32> to vector<16x1xi32>
    %c16_i32 = arith.constant 16 : i32
    %7 = arith.muli %arg2, %c16_i32 : i32
    %8 = vector.broadcast %7 : i32 to vector<16x1xi32>
    %9 = arith.subi %6, %8 : vector<16x1xi32>
    %c0_6 = arith.constant 0 : index
    %c0_7 = arith.constant 0 : index
    %c0_8 = arith.constant 0 : index
    %10 = vector.load %arg5[%c0_6, %c0_7, %c0_8] : memref<1x16x32xf32, #tpu.memory_space<vmem>>, vector<1x16x32xf32>
    %11 = vector.shape_cast %10 : vector<1x16x32xf32> to vector<16x32xf32>
    %12 = tpu.iota {dimensions = array<i32: 1>} : vector<16x16xi32>
    %13 = vector.broadcast %9 : vector<16x1xi32> to vector<16x16xi32>
    %14 = arith.cmpi eq, %12, %13 : vector<16x16xi32>
    %15 = arith.extui %14 : vector<16x16xi1> to vector<16x16xi32>
    %16 = arith.sitofp %15 : vector<16x16xi32> to vector<16x16xf32>
    %cst = arith.constant dense<0.000000e+00> : vector<16x32xf32>
    %17 = tpu.matmul %16, %4, %cst {dimension_numbers = #tpu.dot_dimension_numbers<[1], [0], [0], [1], [0, 0, 1, 1], [], []>, precision = #tpu.contract_precision<fp32>} : vector<16x16xf32>, vector<16x32xf32>, vector<16x32xf32> -> vector<16x32xf32>
    %18 = arith.addf %11, %17 : vector<16x32xf32>
    %c0_9 = arith.constant 0 : index
    %c0_10 = arith.constant 0 : index
    %c0_11 = arith.constant 0 : index
    %19 = vector.load %arg5[%c0_9, %c0_10, %c0_11] : memref<1x16x32xf32, #tpu.memory_space<vmem>>, vector<1x16x32xf32>
    %20 = vector.shape_cast %19 : vector<1x16x32xf32> to vector<16x32xf32>
    %21 = vector.shape_cast %18 : vector<16x32xf32> to vector<1x16x32xf32>
    tpu.vector_store %arg5[%c0_9, %c0_10, %c0_11], %21 {strides = array<i32>} : memref<1x16x32xf32, #tpu.memory_space<vmem>>, vector<1x16x32xf32>,
    return
  }
  func.func @transform_0(%arg0: i32, %arg1: i32, %arg2: i32) -> (i32, i32, i32) {
    %c0_i32 = arith.constant 0 : i32
    %c0_i32_0 = arith.constant 0 : i32
    return %arg0, %arg1, %c0_i32 : i32, i32, i32
  }
  func.func @transform_1(%arg0: i32, %arg1: i32, %arg2: i32) -> (i32, i32, i32) {
    %c0_i32 = arith.constant 0 : i32
    %c0_i32_0 = arith.constant 0 : i32
    return %arg0, %arg2, %c0_i32 : i32, i32, i32
  }
  func.func @transform_2(%arg0: i32, %arg1: i32, %arg2: i32) -> (i32, i32, i32) {
    %c0_i32 = arith.constant 0 : i32
    %c0_i32_0 = arith.constant 0 : i32
    return %arg0, %arg1, %c0_i32 : i32, i32, i32
  }
}

</mosaic_0001>

<bundles_post_ra>
// kernel: tpu_custom_call.1
= control target key start
LH: loop header
LB: loop body
LE: loop exit
PB: predicated region body
PF: predicated region fallthrough
CT: control target
= control target key end

     0   :  { %7 = vsyncpa [#allocation3], 0  ;;  %s1269_s0 = inlined_call_operand.vmem [shape: s32[2,16,1], index: 0, kind: input, shape index: {}]   ;;  %s1270_s1 = inlined_call_operand.vmem [shape: f32[2,16,32], index: 1, kind: input, shape index: {}]   ;;  %s1271_s2 = inlined_call_operand.hbm [shape: f32[2,16,32], index: 2, kind: output, shape index: {}]  }
   0x1   :  { %9 = vsyncpa [#allocation3 + $0x1], 0  ;;  %s1127_s9 = smov 0   ;;  %s1129_s10 = smov 0  }
   0x2   :  { %s1131_s11 = smov 0   ;;  %s1133_s12 = smov 0  }
   0x3   :  { %s1135_s13 = smov 0   ;;  %s1137_s14 = smov 0  }
   0x4 LB: > { %s877_s15 = sadd.s32 4294967295, %s1105_s14   ;;  %s878_s16 = sadd.s32 4294967294, %s1105_s14   ;;  %s1105_s14 = sphi %s1137_s14, %s15_s14   ;;  %s1101_s13 = sphi %s1135_s13, %s1278_s13   ;;  %s1097_s12 = sphi %s1133_s12, %s1277_s12   ;;  %s1093_s11 = sphi %s1131_s11, %s1276_s11   ;;  %s1089_s10 = sphi %s1129_s10, %s1275_s10   ;;  %s1085_s9 = sphi %s1127_s9, %s1274_s9  }
   0x5   : > { %s34_s17 = sadd.s32 1, %s1101_s13  ;;  %s99_s18 = sadd.s32 1, %s1093_s11 }
   0x6   : > { %p36_p0 = scmp.ge.s32.totalorder %s34_s17, 2  ;;  %p109_p1 = scmp.ne.s32.totalorder %s1093_s11, %s1089_s10 }
   0x7   : > { %p110_p2 = scmp.eq.s32.totalorder %s877_s15, 1  ;;  %p115_p3 = scmp.ne.s32.totalorder %s1089_s10, %s1085_s9 }
   0x8   : > { %s1280_s17 = smov (%p36_p0, %s34_s17), 0  ;;  %p116_p5 = scmp.eq.s32.totalorder %s878_s16, 1 }
   0x9   : > { %p1167_p4 = por %p110_p2, %p109_p1  ;;  %s94_s20 = ssub.s32 %s1101_s13, %s1280_s17 }
   0xa   : > { %p881_p6 = scmp.ge.s32.totalorder %s1105_s14, 1  ;;  %p97_p7 = scmp.eq.s32.totalorder %s94_s20, 0 }
   0xb   : > { %p1174_p8 = por %p116_p5, %p115_p3  ;;  %p160_p9 = scmp.lt.s32.totalorder %s1105_s14, 3 }
   0xc   : > { %s1180_s22 = scalar_select %p97_p7, %s1093_s11, %s99_s18  }
   0xd   : > { %p161_p10 = pnand %p881_p6, %p160_p9 }
   0xe   : > { %p196_p11 = scmp.lt.s32.totalorder (!%p161_p10), %s1097_s12, 1  ;;  %s192_s24 = sand.u32 (!%p161_p10), 1, %s1089_s10  }
   0xf   : > { %164 = sbr.rel (%p161_p10) target bundleno = 388 (0x184), region = 28  ;;  %s882_s26 = sshll.u32 (!%p161_p10), %s192_s24, 4 }
  0x10   : > { %s1193_s5 = scalar_lea.vmem (!%p161_p10), [#allocation2], %s882_s26  ;;  %s902_s6 = sshll.u32 (!%p161_p10), %s1097_s12, 8 }
  0x11   : > { %s777_s7 = sshll.u32 (!%p161_p10), %s1193_s5, 4  ;;  %s1214_s16 = scalar_lea.hbm (!%p161_p10), %s1271_s2, %s902_s6  ;;  %s1216_s7 = int_to_ptr.vmem [resolvable:$true] %s777_s7 }
  0x12   : > { %s1029_s18 = scalar_lea.vmem (!%p161_p10), %s1216_s7, 256  ;;  %s1109_s20 = smov (!%p161_p10), [#allocation2]  }
  0x13   : > { %p1030_p12 = scmp.ne.s32.totalorder (!%p161_p10), %s1216_s7, %s1029_s18 }
  0x14   : > { %v1107_v0 = vmov 0   ;;  %s197_s23 = scalar_select %p196_p11, %s1097_s12, 1  ;;  %vm220_vm0 = vcmask 261120   ;;  %v1108_v6 = vmov 0.0   ;;  %v233_v16 = vlaneseq }
  0x15   : > { %1028 = vset.pattern.permute.xlu0 %v1107_v0  ;;  %221 = vst.msk [vmem:[%s1193_s5] sm:$0xff] %vm220_vm0, %v1108_v6  ;;  %222 = vst.msk [vmem:[%s1193_s5 + $0x8] sm:$0xff] %vm220_vm0, %v1108_v6  ;;  %vm247_vm1 = vcmask 130048   ;;  %s1224_s12 = scalar_lea.sflag [#allocation3], %s192_s24  ;;  %p1031_p13 = pnand %p1030_p12, %p1167_p4 }
  0x16   : > { %s900_s25 = sshll.u32 %s197_s23, 4  ;;  %v234_v17 = vand.u32 127, %v233_v16  ;;  %s1033_s23 = sshll.u32 %s1109_s20, 4  ;;  %s1034_s23 = int_to_ptr.vmem [resolvable:$false] %s1033_s23 }
  0x17   : > { %s203_s29 = scalar_lea.vmem %s1269_s0, %s900_s25  ;;  %s213_s4 = scalar_lea.vmem %s1270_s1, %s900_s25 }
  0x18   : > { %v223_v1 = vld [vmem:[%s213_s4] sm:$0xff]  ;;  %v224_v2 = vld [vmem:[%s213_s4 + $0x8] sm:$0xff]  ;;  %p1032_p0 = pneg %p1031_p13  ;;  %s1035_s25 = scalar_lea.vmem %s1034_s23, 512 }
  0x19   : > { %v225_v3 = vld [vmem:[%s203_s29] sm:$0xff]  ;;  %v283_v4 = vand.u32 4294901760, %v224_v2  ;;  %v286_v5 = vand.u32 4294901760, %v223_v1  ;;  %v226_v7 = vld [vmem:[%s203_s29 + $0x8] sm:$0xff]  ;;  %p1036_p1 = scmp.lt.s32.totalorder %s1216_s7, %s1034_s23  ;;  %p1037_p2 = scmp.lt.s32.totalorder %s1035_s25, %s1029_s18 }
  0x1a   : > { %236 = vperm.xlu0 %1028, %v225_v3  }
  0x1b   : > { %v371_v8 = vsub.f32 %v224_v2, %v283_v4  ;;  %v378_v9 = vsub.f32 %v223_v1, %v286_v5  ;;  %927 = vmatprep.subr.mxu0 %v283_v4  ;;  %p1038_p3 = por %p1037_p2, %p1036_p1 }
  0x1c   : > { %928 = vmatpush3.msra.mxu0 %v283_v4  ;;  %v232_v49 = vld [vmem:[%s1193_s5 + $0x8] sm:$0xff]  ;;  %v231_v54 = vld [vmem:[%s1193_s5] sm:$0xff] }
  0x1d   : > { %v372_v10 = vand.u32 4294901760, %v371_v8  ;;  %v379_v11 = vand.u32 4294901760, %v378_v9  ;;  %929 = vmatprep.subr.mxu0 %v286_v5  ;;  %p1039_p5 = pnand %p1038_p3, %p1032_p0 }
  0x1e   : > { %239 = vperm.xlu0 %1028, %v226_v7   ;;  %930 = vmatpush3.msra.mxu0 %v286_v5 }
  0x1f   : > { %v373_v12 = vsub.f32 %v371_v8, %v372_v10  ;;  %v380_v13 = vsub.f32 %v378_v9, %v379_v11  ;;  %941 = vmatprep.subr.mxu0 %v371_v8 }
  0x21   : > { %v374_v14 = vand.u32 4294901760, %v373_v12  ;;  %v381_v15 = vand.u32 4294901760, %v380_v13 }
  0x23   : > { %934 = vmatprep.subr.mxu1 %v374_v14 }
  0x24   : > { %935 = vmatpush3.msra.mxu1 %v374_v14 }
  0x25   : > { %936 = vmatprep.subr.mxu1 %v381_v15 }
  0x26   : > { %937 = vmatpush3.msra.mxu1 %v381_v15 }
  0x27   : > { %948 = vmatprep.subr.mxu1 %v283_v4 }
  0x95   : > { %v237_v18 = vpop.permute.xlu0 %236 }
  0x96   : > { %vm241_vm2 = vcmp.eq.s32.totalorder %v234_v17, %v237_v18 }
  0x97   : > { %v887_v19 = vsel %vm241_vm2, 1.0, %v1108_v6 }
  0x98   : > { %v249_v20 = vsel %vm247_vm1, %v887_v19, 0  ;;  %938 = vmatprep.mubr.msk.f32.mxu1 %vm247_vm1, %v887_v19 }
  0x99   : > { %v322_v21 = vsub.f32 %v249_v20, %v249_v20  ;;  %v240_v22 = vpop.permute.xlu0 %239 }
  0x9a   : > { %vm242_vm3 = vcmp.eq.s32.totalorder %v234_v17, %v240_v22 }
  0x9b   : > { %v888_v23 = vsel %vm242_vm3, 1.0, %v1108_v6  ;;  %v323_v24 = vand.u32 4294901760, %v322_v21 }
  0x9c   : > { %v252_v25 = vsel %vm247_vm1, %v888_v23, 0  ;;  %939 = vmatmul.mubr.msk.f32.vlgmr.msra.gmra.mxu1 %vm247_vm1, %v888_v23 }
  0x9d   : > { %v332_v26 = vsub.f32 %v252_v25, %v252_v25  ;;  %952 = vmatprep.mubr.f32.mxu1 %v323_v24  ;;  %949 = vmatpush3.msra.mxu1 %v283_v4  ;;  %v324_v27 = vsub.f32 %v322_v21, %v323_v24 }
  0x9e   : > { %950 = vmatprep.subr.mxu1 %v286_v5 }
  0x9f   : > { %951 = vmatpush3.msra.mxu1 %v286_v5  ;;  %v325_v28 = vand.u32 4294901760, %v324_v27  ;;  %v333_v29 = vand.u32 4294901760, %v332_v26 }
  0xa0   : > { %962 = vmatprep.subr.mxu1 %v283_v4 }
  0xa1   : > { %931 = vmatprep.mubr.f32.mxu0 %v325_v28  ;;  %953 = vmatmul.mubr.f32.vlgmr.msra.gmra.mxu1 %v333_v29  ;;  %v334_v30 = vsub.f32 %v332_v26, %v333_v29 }
  0xa2   : > { %963 = vmatpush3.msra.mxu1 %v283_v4  ;;  %966 = vmatprep.mubr.msk.f32.mxu1 %vm247_vm1, %v887_v19 }
  0xa3   : > { %964 = vmatprep.subr.mxu1 %v286_v5  ;;  %v335_v31 = vand.u32 4294901760, %v334_v30 }
  0xa4   : > { %965 = vmatpush3.msra.mxu1 %v286_v5 }
  0xa5   : > { %932 = vmatmul.mubr.f32.vlgmr.msra.gmra.mxu0 %v335_v31  ;;  %967 = vmatmul.mubr.msk.f32.vlgmr.msra.gmra.mxu1 %vm247_vm1, %v888_v23 }
  0xa6   : > { %942 = vmatpush3.msra.mxu0 %v371_v8  ;;  %945 = vmatprep.mubr.f32.mxu0 %v322_v21 }
  0xa7   : > { %943 = vmatprep.subr.mxu0 %v378_v9 }
  0xa8   : > { %944 = vmatpush3.msra.mxu0 %v378_v9 }
  0xa9   : > { %955 = vmatprep.subr.mxu0 %v372_v10  ;;  %946 = vmatmul.mubr.f32.vlgmr.msra.gmra.mxu0 %v332_v26 }
  0xaa   : > { %956 = vmatpush3.msra.mxu0 %v372_v10  ;;  %959 = vmatprep.mubr.msk.f32.mxu0 %vm247_vm1, %v887_v19 }
  0xab   : > { %957 = vmatprep.subr.mxu0 %v379_v11 }
  0xac   : > { %958 = vmatpush3.msra.mxu0 %v379_v11 }
  0xad   : > { %960 = vmatmul.mubr.msk.f32.vlgmr.msra.gmra.mxu0 %vm247_vm1, %v888_v23 }
 0x15c   : > { %v940_v32 = vpop.f32.mrf.mxu1 }
 0x15e   : > { %v418_v33 = vpop.f32.mrf.mxu1 }
 0x161   : > { %v954_v34 = vpop.f32.mrf.mxu1 }
 0x163   : > { %v582_v38 = vpop.f32.mrf.mxu1 }
 0x165   : > { %v933_v35 = vpop.f32.mrf.mxu0  ;;  %v968_v45 = vpop.f32.mrf.mxu1 }
 0x166   : > { %v425_v37 = vadd.f32 %v940_v32, %v933_v35 }
 0x167   : > { %v327_v36 = vpop.f32.mrf.mxu0  ;;  %v746_v53 = vpop.f32.mrf.mxu1 }
 0x168   : > { %v419_v40 = vadd.f32 %v418_v33, %v327_v36 }
 0x169   : > { %v947_v39 = vpop.f32.mrf.mxu0 }
 0x16a   : > { %v508_v41 = vadd.f32 %v947_v39, %v425_v37 }
 0x16b   : > { %v500_v42 = vpop.f32.mrf.mxu0 }
 0x16c   : > { %v501_v43 = vadd.f32 %v500_v42, %v419_v40  ;;  %v591_v44 = vadd.f32 %v954_v34, %v508_v41 }
 0x16d   : > { %v961_v46 = vpop.f32.mrf.mxu0 }
 0x16e   : > { %v674_v47 = vadd.f32 %v961_v46, %v591_v44  ;;  %v583_v48 = vadd.f32 %v582_v38, %v501_v43 }
 0x16f   : > { %v667_v50 = vpop.f32.mrf.mxu0 }
 0x170   : > { %v753_v51 = vadd.f32 %v968_v45, %v674_v47  ;;  %v668_v52 = vadd.f32 %v667_v50, %v583_v48 }
 0x172   : > { %v757_v55 = vadd.f32 %v753_v51, %v232_v49  ;;  %v747_v56 = vadd.f32 %v746_v53, %v668_v52 }
 0x174   : > { %760 = vst.msk [vmem:[%s1193_s5 + $0x8] sm:$0xff] %vm220_vm0, %v757_v55  ;;  %v756_v57 = vadd.f32 %v747_v56, %v231_v54 }
 0x176   : > { %759 = vst.msk [vmem:[%s1193_s5] sm:$0xff] %vm220_vm0, %v756_v57 }
 0x177   : > { %1042 = shalt.err (!%p1039_p5)
}
 0x178   : > { %s1043_s24 = scalar_lea.hbm %s1214_s16, 256  ;;  %s1047_s28 = scalar_lea.hbm %s1271_s2, 512 }
 0x179   : > { %p1044_p6 = scmp.ne.s32.totalorder %s1214_s16, %s1043_s24  ;;  %p1048_p10 = scmp.lt.s32.totalorder %s1214_s16, %s1271_s2 }
 0x17a   : > { %p1049_p11 = scmp.lt.s32.totalorder %s1047_s28, %s1043_s24 }
 0x17b   : > { %p1045_p7 = pnand %p1044_p6, %p1167_p4 }
 0x17c   : > { %p1050_p12 = por %p1049_p11, %p1048_p10 }
 0x17d   : > { %p1046_p9 = pneg %p1045_p7 }
 0x17f   : > { %p1051_p13 = pnand %p1050_p12, %p1046_p9 }
 0x181   : > { %1054 = shalt.err (!%p1051_p13)
}
 0x182   : > { %s1110_s3 = smov 128   ;;  %s1111_s4 = smov 8  }
 0x183   : > { %969 = dma.vmem_to_hbm [thread:$0]  (%p1167_p4), %s1216_s7, 256, %s1214_s16, %s1224_s12, %s1110_s3, %s1110_s3, %s1111_s4  }
 0x184 PF: > { %p975_p0 = scmp.ge.s32.totalorder %s1105_s14, 2  ;;  %s792_s5 = sand.u32 1, %s1085_s9  }
 0x185   : > { %s793_s6 = scalar_lea.sflag [#allocation3], %s792_s5 }
 0x186   : > { %p972_p1 = pnand %p975_p0, %p1174_p8 }
 0x188   : > { %p973_p2 = pneg %p972_p1 }
 0x18a   : > { %1080 = dma.done.wait (%p973_p2), %s793_s6, 256  }
 0x18b   : > { %1082 = vsyncadd (%p973_p2), %s793_s6, 4294967040  ;;  %s15_s14 = sadd.s32 1, %s1105_s14   ;;  %s1274_s9 = smov %s1089_s10 }
 0x18c   : > { %p12_p3 = scmp.ge.s32.totalorder %s15_s14, 4   ;;  %s1275_s10 = smov %s1093_s11 }
 0x18d   : > { %s1276_s11 = smov %s1180_s22  ;;  %s1277_s12 = smov %s1101_s13 }
 0x18e   : > { %s1278_s13 = smov %s1280_s17  ;;  %14 = sbr.rel (!%p12_p3) target bundleno = 4 (0x4), region = 70 }
 0x193   :  { %798 = vsyncpa [#allocation3], 1 }
 0x194   :  { %800 = vsyncpa [#allocation3 + $0x1], 1 }

</bundles_post_ra>
